<compile_context>
chip_gen: v7x
topology: tpu7x:2x2x1
jax: 0.10.0
libtpu: 0.0.40
codegen_flags: <defaults>
</compile_context>

<pallas_src>
import math

import jax
import jax.numpy as jnp
from jax.experimental import pallas as pl
from jax.experimental.pallas import tpu as pltpu


def _add_pos_kernel(x_ref, pos_ref, o_ref):
    # Refs are 2-D (tn, D): batch dim squeezed away, D full-extent on lanes,
    # so the add is a single VPU pass and stores are lane-dense vst (only the
    # optional partial last N-tile gets masked edge stores).
    o_ref[...] = x_ref[...] + pos_ref[...]


def _vmem_budget_and_limit():
    """Derive the pipeline-buffer budget and an explicit scoped-VMEM limit from
    the chip at trace time: one code path that is safe on v5e (16 MiB default
    scoped limit), large on v6e (128 MiB physical) and respects v7x's smaller
    64 MiB physical VMEM."""
    try:
        cap = pltpu.get_tpu_info().vmem_capacity_bytes
    except Exception:
        cap = 64 * 1024 * 1024          # conservative (v7x per-core) fallback
    budget = cap // 2                   # bytes available for pipeline buffers
    limit = min(cap, budget + (8 << 20))  # explicit limit + headroom
    return budget, limit


def _pick_row_tile(N, D, itemsize, budget_bytes):
    """Sublane-aligned row tile as large as the VMEM budget allows.
    Pipeline buffers: x(2) + pos(2) + out(2) = 6 tiles of (tn, D).
    No divisor requirement on N: the grid uses pl.cdiv and the last tile may
    be partial, so unlucky N (e.g. 8*prime) never degenerates to tiny tiles."""
    sublane = max(8, 32 // itemsize)            # 8 f32, 16 bf16, 32 int8
    bytes_per_row = max(1, D * itemsize)
    max_rows = max(sublane, budget_bytes // (6 * bytes_per_row))
    target = min(4096, max_rows)                # amortize ~0.35us/step overhead
    if N <= target:
        return N                                # single full-extent tile (layout-legal)
    return max(sublane, (target // sublane) * sublane)


def _lane_fold_factor(N, D):
    """If D is not a multiple of 128, fold k patches into the lane dimension
    (reshape (B,N,D)->(B,N//k,k*D)) so output stores are unmasked lane-dense.
    Returns 1 when no clean fold exists (kernel stays correct, just masked)."""
    if D % 128 == 0:
        return 1
    k = math.lcm(D, 128) // D
    if 1 < k <= N and N % k == 0:
        return k
    return 1


def patch_position_embedding(x, pos_emb, *, force_pallas=False, donate_x=False):
    """x: (B, N, D); pos_emb: (1, N, D). Returns x + pos_emb (broadcast over B)."""
    B, N, D = x.shape
    assert pos_emb.shape == (1, N, D)

    # Match PyTorch type promotion (e.g. bf16 activations + f32 parameter -> f32),
    # instead of silently downcasting the parameter to the activation dtype.
    out_dtype = jnp.promote_types(x.dtype, pos_emb.dtype)
    x = x.astype(out_dtype)
    pos_emb = pos_emb.astype(out_dtype)
    itemsize = jnp.dtype(out_dtype).itemsize

    # A standalone bandwidth-bound add pays a full read+write of the activation
    # plus launch/prologue; below a few MiB let XLA fuse it into neighbours.
    if not force_pallas and x.size * itemsize < 4 * 1024 * 1024:
        return x + pos_emb

    # Fold patches into lanes for narrow / non-128-multiple embedding dims so the
    # output is lane-dense (no-op for typical D = 512/768/1024).
    k = _lane_fold_factor(N, D)
    Nf, Df = N // k, k * D
    xk = x.reshape(B, Nf, Df)
    pk = pos_emb.reshape(1, Nf, Df)

    budget_bytes, vmem_limit = _vmem_budget_and_limit()
    tn = _pick_row_tile(Nf, Df, itemsize, budget_bytes)

    # N-tiles OUTER, batch INNER: the pos_emb block index changes only on the
    # outer axis, so it is re-fetched once per N-tile, not once per (n, b) step.
    # NOTE: pos_emb is left at the default 2-deep buffering; pl.Buffered(1)
    # would free ~1/6 of VMEM but the HW-derived budget already has headroom.
    grid = (pl.cdiv(Nf, tn), B)

    flops = B * N * D
    bytes_accessed = 2 * B * N * D * itemsize + N * D * itemsize

    return pl.pallas_call(
        _add_pos_kernel,
        out_shape=jax.ShapeDtypeStruct((B, Nf, Df), out_dtype),
        grid=grid,
        in_specs=[
            # Leading batch dim squeezed (None) -> kernel refs are 2-D (tn, Df).
            pl.BlockSpec((None, tn, Df), lambda n, b: (b, n, 0)),   # x tile
            pl.BlockSpec((None, tn, Df), lambda n, b: (0, n, 0)),   # pos tile (shared)
        ],
        out_specs=pl.BlockSpec((None, tn, Df), lambda n, b: (b, n, 0)),
        compiler_params=pltpu.CompilerParams(
            # Independent output tiles on both axes -> shardable across v7x's
            # two TensorCores; neutral on single-TC v5e/v6e. Tile size is never
            # shrunk just to create a second shardable tile.
            dimension_semantics=("parallel", "parallel"),
            vmem_limit_bytes=int(vmem_limit),
        ),
        cost_estimate=pl.CostEstimate(
            flops=flops, transcendentals=0, bytes_accessed=bytes_accessed),
        # Optional in-place write when the caller can donate x (same shape/dtype).
        input_output_aliases=({0: 0} if donate_x else {}),
    )(xk, pk).reshape(B, N, D)


if __name__ == "__main__":
    # Small shapes consistent with the module: batch=2, num_patches=16, embedding_dim=128.
    B, N, D = 2, 16, 128
    key = jax.random.PRNGKey(0)
    kx, kp = jax.random.split(key)
    x = jax.random.normal(kx, (B, N, D), dtype=jnp.float32)
    # Deterministic "parameter" init (mirrors torch.randn(1, num_patches, embedding_dim)).
    pos_emb = jax.random.normal(kp, (1, N, D), dtype=jnp.float32)

    # force_pallas=True so the test exercises the kernel even at toy sizes.
    out = jax.block_until_ready(patch_position_embedding(x, pos_emb, force_pallas=True))

    ref = x + pos_emb
    assert out.shape == (B, N, D)
    assert out.dtype == ref.dtype
    assert jnp.allclose(out, ref, atol=1e-6), "mismatch vs reference"
    print("KERNEL_OK")
</pallas_src>

<mosaic_0001>
module attributes {stable_mosaic.version = 11 : i64} {
  func.func @_add_pos_kernel(%arg0: i32, %arg1: i32, %arg2: memref<1x16x128xf32, #tpu.memory_space<vmem>>, %arg3: memref<1x16x128xf32, #tpu.memory_space<vmem>>, %arg4: memref<1x16x128xf32, #tpu.memory_space<vmem>>) attributes {dimension_semantics = [#tpu.dimension_semantics<parallel>, #tpu.dimension_semantics<parallel>], iteration_bounds = array<i64: 1, 2>, scalar_prefetch = 0 : i64, scratch_operands = 0 : i64, tpu.core_type = #tpu.core_type<tc>, window_params = [{transform_indices = @transform_0, window_bounds = array<i64: 1, 16, 128>}, {transform_indices = @transform_1, window_bounds = array<i64: 1, 16, 128>}, {transform_indices = @transform_2, window_bounds = array<i64: 1, 16, 128>}]} {
    %c0 = arith.constant 0 : index
    %c0_0 = arith.constant 0 : index
    %c0_1 = arith.constant 0 : index
    %0 = vector.load %arg2[%c0, %c0_0, %c0_1] : memref<1x16x128xf32, #tpu.memory_space<vmem>>, vector<1x16x128xf32>
    %1 = vector.shape_cast %0 : vector<1x16x128xf32> to vector<16x128xf32>
    %c0_2 = arith.constant 0 : index
    %c0_3 = arith.constant 0 : index
    %c0_4 = arith.constant 0 : index
    %2 = vector.load %arg3[%c0_2, %c0_3, %c0_4] : memref<1x16x128xf32, #tpu.memory_space<vmem>>, vector<1x16x128xf32>
    %3 = vector.shape_cast %2 : vector<1x16x128xf32> to vector<16x128xf32>
    %4 = arith.addf %1, %3 : vector<16x128xf32>
    %c0_5 = arith.constant 0 : index
    %c0_6 = arith.constant 0 : index
    %c0_7 = arith.constant 0 : index
    %5 = vector.load %arg4[%c0_5, %c0_6, %c0_7] : memref<1x16x128xf32, #tpu.memory_space<vmem>>, vector<1x16x128xf32>
    %6 = vector.shape_cast %5 : vector<1x16x128xf32> to vector<16x128xf32>
    %7 = vector.shape_cast %4 : vector<16x128xf32> to vector<1x16x128xf32>
    tpu.vector_store %arg4[%c0_5, %c0_6, %c0_7], %7 {strides = array<i32>} : memref<1x16x128xf32, #tpu.memory_space<vmem>>, vector<1x16x128xf32>,
    return
  }
  func.func @transform_0(%arg0: i32, %arg1: i32) -> (i32, i32, i32) {
    %c0_i32 = arith.constant 0 : i32
    %c0_i32_0 = arith.constant 0 : i32
    return %arg1, %arg0, %c0_i32 : i32, i32, i32
  }
  func.func @transform_1(%arg0: i32, %arg1: i32) -> (i32, i32, i32) {
    %c0_i32 = arith.constant 0 : i32
    %c0_i32_0 = arith.constant 0 : i32
    %c0_i32_1 = arith.constant 0 : i32
    return %c0_i32, %arg0, %c0_i32_0 : i32, i32, i32
  }
  func.func @transform_2(%arg0: i32, %arg1: i32) -> (i32, i32, i32) {
    %c0_i32 = arith.constant 0 : i32
    %c0_i32_0 = arith.constant 0 : i32
    return %arg1, %arg0, %c0_i32 : i32, i32, i32
  }
}

</mosaic_0001>

<bundles_post_ra>
// kernel: tpu_custom_call.1
= control target key start
LH: loop header
LB: loop body
LE: loop exit
PB: predicated region body
PF: predicated region fallthrough
CT: control target
= control target key end

     0   :  { %7 = vsyncpa [#allocation3], 0  ;;  %s818_s0 = inlined_call_operand.hbm [shape: f32[2,16,128], index: 0, kind: input, shape index: {}]   ;;  %s819_s1 = inlined_call_operand.hbm [shape: f32[1,16,128], index: 1, kind: input, shape index: {}]   ;;  %s820_s2 = inlined_call_operand.hbm [shape: f32[2,16,128], index: 2, kind: output, shape index: {}]  }
   0x1   :  { %9 = vsyncpa [#allocation3 + $0x1], 0 }
   0x2   :  { %10 = vsyncpa [#allocation6], 0 }
   0x3   :  { %11 = vsyncpa [#allocation4], 0 }
   0x4   :  { %13 = vsyncpa [#allocation4 + $0x1], 0  ;;  %s593_s9 = smov 0   ;;  %s595_s10 = smov 0  }
   0x5   :  { %s597_s11 = smov 0   ;;  %s599_s12 = smov 0  }
   0x6   :  { %s601_s13 = smov 0   ;;  %s603_s14 = smov 0  }
   0x7 LB: > { %s329_s15 = sadd.s32 4294967295, %s569_s14   ;;  %s330_s16 = sadd.s32 4294967294, %s569_s14   ;;  %s569_s14 = sphi %s603_s14, %s19_s14   ;;  %s565_s13 = sphi %s601_s13, %s844_s13   ;;  %s561_s12 = sphi %s599_s12, %s843_s12   ;;  %s557_s11 = sphi %s597_s11, %s842_s11   ;;  %s553_s10 = sphi %s595_s10, %s841_s10   ;;  %s549_s9 = sphi %s593_s9, %s840_s9  }
   0x8   : > { %p53_p0 = scmp.ne.s32.totalorder %s553_s10, %s549_s9  ;;  %p627_p1 = scmp.eq.s32.totalorder %s329_s15, 0 }
   0x9   : > { %p631_p2 = scmp.eq.s32.totalorder %s329_s15, 1  ;;  %p111_p3 = scmp.eq.s32.totalorder %s330_s16, 1 }
   0xa   : > { %s825_s17 = scalar_select %p627_p1, 1, 0 }
   0xb   : > { %s826_s18 = scalar_select %p631_p2, 1, 0 }
   0xc   : > { %p637_p4 = por %p627_p1, %p53_p0  ;;  %p331_p5 = scmp.ge.s32.totalorder %s569_s14, 1 }
   0xd   : > { %p642_p6 = por %p111_p3, %p53_p0  ;;  %p118_p7 = scmp.lt.s32.totalorder %s569_s14, 3 }
   0xe   : > { %s827_s19 = scalar_select %p637_p4, 1, 0 }
   0xf   : > { %s828_s20 = scalar_select %p642_p6, 1, 0 }
  0x10   : > { %p647_p8 = pnand %p331_p5, %p118_p7  ;;  %s571_s22 = smov [#allocation5]  }
  0x11   : > { %s133_s23 = sshll.u32 %s571_s22, 4  ;;  %s28_s25 = sadd.s32 1, %s565_s13  ;;  %s134_s23 = int_to_ptr.vmem [resolvable:$true] %s133_s23 }
  0x12   : > { %s829_s21 = scalar_select %p647_p8, 1, 0 }
  0x13   : > { %p356_p9 = pneg %p647_p8  ;;  %s425_s28 = scalar_lea.hbm %s819_s1, 256 }
  0x14   : > { %p426_p12 = scmp.ne.s32.totalorder %s819_s1, %s425_s28  ;;  %p432_p5 = scmp.lt.u32.totalorder %s425_s28, %s819_s1 }
  0x15   : > { %p656_p11 = pnand %p356_p9, %p627_p1 }
  0x17   : > { %p427_p13 = pneg %p656_p11 }
  0x19   : > { %p428_p0 = pnand %p427_p13, %p426_p12 }
  0x1b   : > { %p429_p3 = pneg %p428_p0 }
  0x1d   : > { %p434_p7 = pnand %p432_p5, %p429_p3 }
  0x1f   : > { %437 = shalt.err (!%p434_p7)
}
  0x20   : > { %s438_s5 = scalar_lea.vmem %s134_s23, 256  ;;  %p446_p1 = scmp.lt.s32.totalorder %s134_s23, %s134_s23 }
  0x21   : > { %p439_p9 = scmp.ne.s32.totalorder %s134_s23, %s438_s5  ;;  %p447_p4 = scmp.lt.s32.totalorder %s438_s5, %s438_s5 }
  0x23   : > { %p441_p10 = pnand %p439_p9, %p427_p13  ;;  %p448_p8 = por %p447_p4, %p446_p1 }
  0x25   : > { %p442_p6 = pneg %p441_p10 }
  0x27   : > { %p449_p2 = pnand %p448_p8, %p442_p6 }
  0x29   : > { %452 = shalt.err (!%p449_p2)
}
  0x2a   : > { %s572_s6 = smov 128   ;;  %s573_s7 = smov 8  }
  0x2b   : > { %359 = dma.hbm_to_vmem [thread:$0]  (!%p656_p11), %s819_s1, 256, %s134_s23, [#allocation6], %s572_s6, %s572_s6, %s573_s7  }
  0x2c   : > { %p29_p1 = scmp.ge.s32.totalorder %s28_s25, 2  ;;  %s40_s16 = sadd.s32 1, %s557_s11 }
  0x2d   : > { %p47_p2 = scmp.ne.s32.totalorder %s557_s11, %s553_s10  ;;  %p48_p4 = scmp.eq.s32.totalorder %s569_s14, 0 }
  0x2e   : > { %s846_s25 = smov (%p29_p1, %s28_s25), 0  ;;  %p832_p8 = scmp.ne.s32.totalorder %s826_s18, 0 }
  0x2f   : > { %p686_p6 = por %p48_p4, %p47_p2  ;;  %s35_s26 = ssub.s32 %s565_s13, %s846_s25 }
  0x30   : > { %p692_p10 = por %p832_p8, %p47_p2  ;;  %p369_p12 = scmp.lt.s32.totalorder %s569_s14, 2 }
  0x31   : > { %p38_p11 = scmp.eq.s32.totalorder %s35_s26, 0  ;;  %s147_s23 = sand.u32 1, %s557_s11  }
  0x32   : > { %s334_s27 = sshll.u32 %s147_s23, 4  ;;  %s346_s29 = sshll.u32 %s565_s13, 8 }
  0x33   : > { %s701_s28 = scalar_select %p38_p11, %s557_s11, %s40_s16  }
  0x34   : > { %s707_s4 = scalar_lea.hbm %s818_s0, %s346_s29  ;;  %s151_s18 = scalar_lea.vmem [#allocation2], %s334_s27 }
  0x35   : > { %s160_s5 = sshll.u32 %s151_s18, 4  ;;  %p713_p13 = pnand %p369_p12, %p686_p6  ;;  %s709_s5 = int_to_ptr.vmem [resolvable:$true] %s160_s5 }
  0x36   : > { %s717_s15 = scalar_lea.sflag [#allocation3], %s147_s23  ;;  %s453_s16 = scalar_lea.hbm %s707_s4, 256 }
  0x37   : > { %p454_p0 = scmp.ne.s32.totalorder %s707_s4, %s453_s16  ;;  %p455_p3 = pneg %p713_p13 }
  0x38   : > { %s458_s22 = scalar_lea.hbm %s818_s0, 512  ;;  %p459_p9 = scmp.lt.u32.totalorder %s707_s4, %s818_s0 }
  0x39   : > { %p456_p5 = pnand %p455_p3, %p454_p0  ;;  %p460_p1 = scmp.lt.u32.totalorder %s458_s22, %s453_s16 }
  0x3a   : > { %p462_p4 = scmp.lt.u32.totalorder %s453_s16, %s707_s4 }
  0x3b   : > { %p457_p7 = pneg %p456_p5  ;;  %p461_p2 = por %p460_p1, %p459_p9 }
  0x3d   : > { %p463_p6 = por %p462_p4, %p461_p2 }
  0x3f   : > { %p464_p8 = pnand %p463_p6, %p457_p7 }
  0x41   : > { %467 = shalt.err (!%p464_p8)
}
  0x42   : > { %s468_s23 = scalar_lea.vmem %s709_s5, 256  ;;  %s574_s3 = smov [#allocation2]  }
  0x43   : > { %p469_p12 = scmp.ne.s32.totalorder %s709_s5, %s468_s23  ;;  %s473_s18 = sshll.u32 %s574_s3, 4  ;;  %s474_s18 = int_to_ptr.vmem [resolvable:$false] %s473_s18 }
  0x44   : > { %s475_s26 = scalar_lea.vmem %s474_s18, 512  ;;  %p476_p5 = scmp.lt.s32.totalorder %s709_s5, %s474_s18 }
  0x45   : > { %p471_p11 = pnand %p469_p12, %p455_p3  ;;  %p477_p9 = scmp.lt.s32.totalorder %s475_s26, %s468_s23 }
  0x47   : > { %p472_p0 = pneg %p471_p11  ;;  %p478_p1 = por %p477_p9, %p476_p5 }
  0x49   : > { %p479_p2 = pnand %p478_p1, %p472_p0 }
  0x4b   : > { %482 = shalt.err (!%p479_p2)
}
  0x4c   : > { %363 = dma.hbm_to_vmem [thread:$0]  (!%p713_p13), %s707_s4, 256, %s709_s5, %s717_s15, %s572_s6, %s572_s6, %s573_s7  }
  0x4d   : > { %p835_p3 = scmp.ne.s32.totalorder %s829_s21, 0 }
  0x4e   : > { %s751_s16 = sand.u32 (!%p835_p3), 1, %s553_s10   ;;  %p836_p7 = scmp.ne.s32.totalorder (!%p835_p3), %s827_s19, 0 }
  0x4f   : > { %172 = sbr.rel (%p835_p3) target bundleno = 116 (0x74), region = 28  ;;  %s338_s27 = sshll.u32 (!%p835_p3), %s751_s16, 4 }
  0x50   : > { %s175_s22 = scalar_lea.sflag (!%p835_p3), [#allocation3], %s751_s16  ;;  %s178_s29 = scalar_lea.vmem (!%p835_p3), [#allocation2], %s338_s27 }
  0x56   : > { %536 = dma.done.wait (%p836_p7), %s175_s22, 256  }
  0x57   : > { %538 = vsyncadd (%p836_p7), %s175_s22, 4294967040  ;;  %p837_p4 = scmp.ne.s32.totalorder %s825_s17, 0 }
  0x59   : > { %540 = dma.done.wait (%p837_p4), [#allocation6], 256  }
  0x5a   : > { %542 = vsyncadd (%p837_p4), [#allocation6], 4294967040  ;;  %s202_s21 = scalar_lea.vmem [#allocation7], %s338_s27  ;;  %s347_s7 = sshll.u32 %s561_s12, 8  ;;  %v206_v0 = vld [vmem:[%s178_s29] sm:$0xff]  ;;  %v207_v2 = vld [vmem:[%s178_s29 + $0x8] sm:$0xff] }
  0x5b   : > { %s230_s6 = sshll.u32 %s202_s21, 4  ;;  %v208_v1 = vld [vmem:[#allocation5] sm:$0xff]  ;;  %v209_v4 = vld [vmem:[#allocation5 + $0x8] sm:$0xff]  ;;  %s769_s17 = scalar_lea.hbm %s820_s2, %s347_s7  ;;  %s764_s6 = int_to_ptr.vmem [resolvable:$true] %s230_s6 }
  0x5c   : > { %v210_v3 = vadd.f32 %v208_v1, %v206_v0  ;;  %v211_v5 = vadd.f32 %v209_v4, %v207_v2  ;;  %s215_s5 = scalar_lea.sflag [#allocation4], %s751_s16  ;;  %s483_s12 = scalar_lea.vmem %s764_s6, 256 }
  0x5d   : > { %p484_p13 = scmp.ne.s32.totalorder %s764_s6, %s483_s12  ;;  %s575_s8 = smov [#allocation7]  }
  0x5e   : > { %212 = vst [vmem:[%s202_s21] sm:$0xff] %v210_v3  ;;  %213 = vst [vmem:[%s202_s21 + $0x8] sm:$0xff] %v211_v5  ;;  %s487_s15 = sshll.u32 %s575_s8, 4  ;;  %s488_s15 = int_to_ptr.vmem [resolvable:$false] %s487_s15 }
  0x5f   : > { %p485_p6 = pnand %p484_p13, %p692_p10  ;;  %s489_s30 = scalar_lea.vmem %s488_s15, 512 }
  0x60   : > { %p490_p12 = scmp.lt.s32.totalorder %s764_s6, %s488_s15  ;;  %p491_p11 = scmp.lt.s32.totalorder %s489_s30, %s483_s12 }
  0x61   : > { %p486_p8 = pneg %p485_p6 }
  0x62   : > { %p492_p0 = por %p491_p11, %p490_p12 }
  0x64   : > { %p493_p5 = pnand %p492_p0, %p486_p8 }
  0x66   : > { %496 = shalt.err (!%p493_p5)
}
  0x67   : > { %s497_s23 = scalar_lea.hbm %s769_s17, 256  ;;  %s501_s26 = scalar_lea.hbm %s820_s2, 512 }
  0x68   : > { %p498_p9 = scmp.ne.s32.totalorder %s769_s17, %s497_s23  ;;  %p502_p3 = scmp.lt.u32.totalorder %s769_s17, %s820_s2 }
  0x69   : > { %p503_p7 = scmp.lt.u32.totalorder %s501_s26, %s497_s23  ;;  %p505_p13 = scmp.lt.u32.totalorder %s497_s23, %s769_s17 }
  0x6a   : > { %p499_p1 = pnand %p498_p9, %p692_p10 }
  0x6b   : > { %p504_p4 = por %p503_p7, %p502_p3 }
  0x6c   : > { %p500_p2 = pneg %p499_p1 }
  0x6d   : > { %p506_p6 = por %p505_p13, %p504_p4 }
  0x6f   : > { %p507_p8 = pnand %p506_p6, %p500_p2 }
  0x71   : > { %510 = shalt.err (!%p507_p8)
}
  0x72   : > { %s576_s29 = smov 128   ;;  %s577_s21 = smov 8  }
  0x73   : > { %354 = dma.vmem_to_hbm [thread:$0]  (%p692_p10), %s764_s6, 256, %s769_s17, %s215_s5, %s576_s29, %s576_s29, %s577_s21  }
  0x74 PF: > { %s245_s7 = sand.u32 1, %s549_s9   ;;  %p838_p12 = scmp.ne.s32.totalorder %s828_s20, 0 }
  0x75   : > { %p839_p11 = scmp.ge.s32.totalorder %s569_s14, 2  ;;  %s246_s19 = scalar_lea.sflag [#allocation4], %s245_s7 }
  0x77   : > { %p365_p0 = pnand %p839_p11, %p838_p12 }
  0x79   : > { %544 = dma.done.wait (!%p365_p0), %s246_s19, 256  }
  0x7a   : > { %546 = vsyncadd (!%p365_p0), %s246_s19, 4294967040  ;;  %s19_s14 = sadd.s32 1, %s569_s14   ;;  %s840_s9 = smov %s553_s10 }
  0x7b   : > { %p16_p5 = scmp.ge.s32.totalorder %s19_s14, 4   ;;  %s841_s10 = smov %s557_s11 }
  0x7c   : > { %s842_s11 = smov %s701_s28  ;;  %s843_s12 = smov %s565_s13 }
  0x7d   : > { %s844_s13 = smov %s846_s25  ;;  %18 = sbr.rel (!%p16_p5) target bundleno = 7 (0x7), region = 78 }
  0x84   :  { %251 = vsyncpa [#allocation3], 1 }
  0x85   :  { %253 = vsyncpa [#allocation3 + $0x1], 1 }
  0x86   :  { %254 = vsyncpa [#allocation6], 1 }
  0x87   :  { %255 = vsyncpa [#allocation4], 1 }
  0x88   :  { %257 = vsyncpa [#allocation4 + $0x1], 1 }

</bundles_post_ra>
